<compile_context>
chip_gen: v6e
topology: v6e:2x2x1
jax: 0.10.0
libtpu: 0.0.40
codegen_flags: <defaults>
</compile_context>

<pallas_src>
import jax
import jax.numpy as jnp
from jax.experimental import pallas as pl
from jax.experimental.pallas import tpu as pltpu


def _risk_agent_kernel(x_ref, w_ref, b_ref, o_ref):
    # x_ref: (B, K)  w_ref: (K, tn)  b_ref: (1, tn)  o_ref: (B, tn)
    y = jnp.dot(x_ref[...], w_ref[...], preferred_element_type=jnp.float32)
    y = y + b_ref[...]                      # broadcast bias over batch rows
    # softmax over axis 0 (batch axis) — matches F.softmax(outputs, dim=0).
    # The full batch lives inside this block, so the reduction is local.
    m = jnp.max(y, axis=0, keepdims=True)
    e = jnp.exp(y - m)
    denom = jnp.sum(e, axis=0, keepdims=True)
    o_ref[...] = (e * pl.reciprocal(denom, approx=False)).astype(o_ref.dtype)


def risk_agent_forward(state, w_t, bias, *, max_tile_n=2048):
    """state: (B, K) f32; w_t: (K, N) f32 (pre-transposed); bias: (N,) f32 -> (B, N) f32."""
    B, K = state.shape
    K2, N = w_t.shape
    assert K == K2
    bias2d = bias.reshape(1, N)

    # Single block whenever the whole output fits comfortably; otherwise the
    # widest lane-multiple tile (<= max_tile_n) that divides N.
    if N <= max_tile_n:
        tn = N
    else:
        assert N % 128 == 0, "large output_size must be a multiple of 128"
        tn = max_tile_n
        while N % tn != 0:
            tn -= 128
    grid_n = N // tn

    cost = pl.CostEstimate(
        flops=2 * B * K * N + 4 * B * N,      # matmul + bias/softmax elementwise
        transcendentals=B * N,                # exp
        bytes_accessed=4 * (B * K + K * N + N + B * N),
    )

    return pl.pallas_call(
        _risk_agent_kernel,
        out_shape=jax.ShapeDtypeStruct((B, N), jnp.float32),
        grid=(grid_n,),
        in_specs=[
            pl.BlockSpec((B, K), lambda j: (0, 0)),    # state (whole, resident)
            pl.BlockSpec((K, tn), lambda j: (0, j)),   # weight column tile
            pl.BlockSpec((1, tn), lambda j: (0, j)),   # bias column tile
        ],
        out_specs=pl.BlockSpec((B, tn), lambda j: (0, j)),
        compiler_params=pltpu.CompilerParams(
            dimension_semantics=("parallel",),
        ),
        cost_estimate=cost,
    )(state, w_t, bias2d)


if __name__ == "__main__":
    # Small, forward-consistent sizes.
    num_phases, num_countries, max_troops = 2, 4, 8
    state_size = 32
    output_size = num_phases * num_countries * num_countries * max_troops  # 256
    B = 8

    key = jax.random.PRNGKey(0)
    k_state, k_w, k_b = jax.random.split(key, 3)

    # Parameters are created directly in the (state_size, output_size) layout
    # the kernel consumes — no per-call transpose (perf-review item).
    bound = 1.0 / (state_size ** 0.5)
    w_t = jax.random.uniform(k_w, (state_size, output_size),
                             minval=-bound, maxval=bound, dtype=jnp.float32)
    b = jax.random.uniform(k_b, (output_size,),
                           minval=-bound, maxval=bound, dtype=jnp.float32)
    state = jax.random.normal(k_state, (B, state_size), dtype=jnp.float32)

    out = risk_agent_forward(state, w_t, b)
    out = jax.block_until_ready(out)

    # Pure-JAX reference: nn.Linear (x @ W^T + b) followed by softmax(dim=0).
    ref_logits = state @ w_t + b
    ref = jax.nn.softmax(ref_logits, axis=0)
    assert out.shape == (B, output_size)
    assert jnp.allclose(out, ref, atol=1e-5, rtol=1e-5), "mismatch vs reference"

    print("KERNEL_OK")
</pallas_src>

<mosaic_0001>
module attributes {stable_mosaic.version = 11 : i64} {
  func.func @_risk_agent_kernel(%arg0: i32, %arg1: memref<8x32xf32, #tpu.memory_space<vmem>>, %arg2: memref<32x256xf32, #tpu.memory_space<vmem>>, %arg3: memref<1x256xf32, #tpu.memory_space<vmem>>, %arg4: memref<8x256xf32, #tpu.memory_space<vmem>>) attributes {dimension_semantics = [#tpu.dimension_semantics<parallel>], iteration_bounds = array<i64: 1>, scalar_prefetch = 0 : i64, scratch_operands = 0 : i64, tpu.core_type = #tpu.core_type<tc>, window_params = [{pipeline_mode = #tpu.pipeline_mode<synchronous>, transform_indices = @transform_0, window_bounds = array<i64: 8, 32>}, {transform_indices = @transform_1, window_bounds = array<i64: 32, 256>}, {transform_indices = @transform_2, window_bounds = array<i64: 1, 256>}, {transform_indices = @transform_3, window_bounds = array<i64: 8, 256>}]} {
    %c0 = arith.constant 0 : index
    %c0_0 = arith.constant 0 : index
    %0 = vector.load %arg1[%c0, %c0_0] : memref<8x32xf32, #tpu.memory_space<vmem>>, vector<8x32xf32>
    %c0_1 = arith.constant 0 : index
    %c0_2 = arith.constant 0 : index
    %1 = vector.load %arg2[%c0_1, %c0_2] : memref<32x256xf32, #tpu.memory_space<vmem>>, vector<32x256xf32>
    %cst = arith.constant dense<0.000000e+00> : vector<8x256xf32>
    %2 = tpu.matmul %0, %1, %cst {dimension_numbers = #tpu.dot_dimension_numbers<[1], [0], [0], [1], [0, 0, 1, 1], [], []>} : vector<8x32xf32>, vector<32x256xf32>, vector<8x256xf32> -> vector<8x256xf32>
    %c0_3 = arith.constant 0 : index
    %c0_4 = arith.constant 0 : index
    %3 = vector.load %arg3[%c0_3, %c0_4] : memref<1x256xf32, #tpu.memory_space<vmem>>, vector<1x256xf32>
    %4 = vector.broadcast %3 : vector<1x256xf32> to vector<8x256xf32>
    %5 = arith.addf %2, %4 : vector<8x256xf32>
    %cst_5 = arith.constant dense<0xFF800000> : vector<256xf32>
    %6 = vector.multi_reduction <maximumf>, %5, %cst_5 [0] : vector<8x256xf32> to vector<256xf32>
    %7 = vector.shape_cast %6 : vector<256xf32> to vector<1x256xf32>
    %8 = vector.broadcast %7 : vector<1x256xf32> to vector<8x256xf32>
    %9 = arith.subf %5, %8 : vector<8x256xf32>
    %10 = math.exp %9 : vector<8x256xf32>
    %cst_6 = arith.constant dense<0.000000e+00> : vector<256xf32>
    %11 = vector.multi_reduction <add>, %10, %cst_6 [0] : vector<8x256xf32> to vector<256xf32>
    %12 = vector.shape_cast %11 : vector<256xf32> to vector<1x256xf32>
    %13 = tpu.reciprocal %12 : vector<1x256xf32> -> vector<1x256xf32>
    %14 = vector.broadcast %13 : vector<1x256xf32> to vector<8x256xf32>
    %15 = arith.mulf %10, %14 : vector<8x256xf32>
    %c0_7 = arith.constant 0 : index
    %c0_8 = arith.constant 0 : index
    %16 = vector.load %arg4[%c0_7, %c0_8] : memref<8x256xf32, #tpu.memory_space<vmem>>, vector<8x256xf32>
    tpu.vector_store %arg4[%c0_7, %c0_8], %15 {strides = array<i32>} : memref<8x256xf32, #tpu.memory_space<vmem>>, vector<8x256xf32>,
    return
  }
  func.func @transform_0(%arg0: i32) -> (i32, i32) {
    %c0_i32 = arith.constant 0 : i32
    %c0_i32_0 = arith.constant 0 : i32
    %c0_i32_1 = arith.constant 0 : i32
    return %c0_i32, %c0_i32_0 : i32, i32
  }
  func.func @transform_1(%arg0: i32) -> (i32, i32) {
    %c0_i32 = arith.constant 0 : i32
    %c0_i32_0 = arith.constant 0 : i32
    return %c0_i32, %arg0 : i32, i32
  }
  func.func @transform_2(%arg0: i32) -> (i32, i32) {
    %c0_i32 = arith.constant 0 : i32
    %c0_i32_0 = arith.constant 0 : i32
    return %c0_i32, %arg0 : i32, i32
  }
  func.func @transform_3(%arg0: i32) -> (i32, i32) {
    %c0_i32 = arith.constant 0 : i32
    %c0_i32_0 = arith.constant 0 : i32
    return %c0_i32, %arg0 : i32, i32
  }
}

</mosaic_0001>

<bundles_post_ra>
// kernel: tpu_custom_call.1
= control target key start
LH: loop header
LB: loop body
LE: loop exit
PB: predicated region body
PF: predicated region fallthrough
CT: control target
= control target key end

     0   :  { %8 = vsyncpa [#allocation3], 0  ;;  %s308_s0 = inlined_call_operand.hbm [shape: f32[8,32], index: 0, kind: input, shape index: {}]   ;;  %s309_s1 = inlined_call_operand.hbm [shape: f32[32,256], index: 1, kind: input, shape index: {}]   ;;  %s310_s2 = inlined_call_operand.vmem [shape: f32[1,256], index: 2, kind: input, shape index: {}]   ;;  %s311_s3 = inlined_call_operand.hbm [shape: f32[8,256], index: 3, kind: output, shape index: {}]  }
   0x1   :  { %9 = vsyncpa [#allocation6], 0 }
   0x2   :  { %10 = vsyncpa [#allocation4], 0  ;;  %s270_s12 = smov [#allocation2]   ;;  %s271_s14 = smov [#allocation5]  }
   0x3   :  { %s17_s13 = sshll.u32 %s270_s12, 4  ;;  %s26_s15 = sshll.u32 %s271_s14, 4  ;;  %s18_s13 = int_to_ptr.vmem [resolvable:$true] %s17_s13  ;;  %s27_s15 = int_to_ptr.vmem [resolvable:$true] %s26_s15 }
   0x4   :  { %s212_s16 = scalar_lea.vmem %s18_s13, 128  ;;  %p217_p1 = scmp.lt.s32.totalorder %s18_s13, %s18_s13 }
   0x5   :  { %p213_p0 = scmp.ne.s32.totalorder %s18_s13, %s212_s16  ;;  %p218_p2 = scmp.lt.s32.totalorder %s212_s16, %s212_s16 }
   0x7   :  { %p219_p3 = por %p218_p2, %p217_p1 }
   0x9   :  { %p220_p4 = pnand %p219_p3, %p213_p0 }
   0xb   :  { %223 = shalt.err (!%p220_p4)
}
   0xc   :  { %20 = dma.hbm_to_vmem [thread:$0]  %s308_s0, 128, %s18_s13, [#allocation3]  }
   0xd   :  { %s232_s19 = scalar_lea.vmem %s27_s15, 1024  ;;  %p237_p6 = scmp.lt.s32.totalorder %s27_s15, %s27_s15 }
   0xe   :  { %p233_p5 = scmp.ne.s32.totalorder %s27_s15, %s232_s19  ;;  %p238_p7 = scmp.lt.s32.totalorder %s232_s19, %s232_s19 }
  0x10   :  { %p239_p8 = por %p238_p7, %p237_p6 }
  0x12   :  { %p240_p9 = pnand %p239_p8, %p233_p5 }
  0x14   :  { %243 = shalt.err (!%p240_p9)
}
  0x15   :  { %s272_s20 = smov 256   ;;  %s273_s21 = smov 16  }
  0x16   :  { %32 = dma.hbm_to_vmem [thread:$0]  %s309_s1, 1024, %s27_s15, [#allocation6], %s272_s20, %s272_s20, %s273_s21  }
  0x17   :  { %264 = dma.done.wait [#allocation3], 128  }
  0x18   :  { %265 = vsyncadd [#allocation3], 4294967168 }
  0x19   :  { %266 = dma.done.wait [#allocation6], 1024  }
  0x1a   :  { %267 = vsyncadd [#allocation6], 4294966272  ;;  %v274_v0 = vmov 0.0   ;;  %v49_v1 = vld [vmem:[#allocation5 + $0x38] sm:$0xff]  ;;  %v48_v2 = vld [vmem:[#allocation5 + $0x30] sm:$0xff]  ;;  %vm62_vm0 = vcmask 261120   ;;  %v52_v10 = vlaneseq }
  0x1b   :  { %130 = vmatprep.mubr.f32.mxu0 %v274_v0  ;;  %v47_v3 = vld [vmem:[#allocation5 + $0x28] sm:$0xff]  ;;  %90 = vmatprep.subr.mxu0 %v49_v1  ;;  %v46_v4 = vld [vmem:[#allocation5 + $0x20] sm:$0xff]  ;;  %v45_v5 = vld [vmem:[#allocation5 + $0x18] sm:$0xff] }
  0x1c   :  { %91 = vmatpush1.msra.mxu0 %v48_v2  ;;  %v44_v6 = vld [vmem:[#allocation5 + $0x10] sm:$0xff]  ;;  %v43_v7 = vld [vmem:[#allocation5 + $0x8] sm:$0xff]  ;;  %v42_v8 = vld [vmem:[#allocation5] sm:$0xff]  ;;  %v53_v11 = vshrl.u32 %v52_v10, 7 }
  0x1d   :  { %92 = vmatprep.subr.mxu0 %v47_v3  ;;  %v41_v9 = vld [vmem:[#allocation2] sm:$0xff] }
  0x1e   :  { %93 = vmatpush1.msra.mxu0 %v46_v4  ;;  %v54_v12 = vsub.s32 0, %v53_v11  ;;  %v50_v13 = vld [vmem:[%s310_s2] sm:$0x3]  ;;  %v58_v14 = vsub.s32 1, %v53_v11  ;;  %s275_s2 = smov [#allocation7]  }
  0x1f   :  { %94 = vmatprep.subr.mxu0 %v45_v5  ;;  %s179_s24 = sshll.u32 %s275_s2, 4  ;;  %s180_s24 = int_to_ptr.vmem [resolvable:$true] %s179_s24 }
  0x20   :  { %95 = vmatpush1.msra.mxu0 %v44_v6  ;;  %v55_v15 = vrot.slane %v50_v13, %v54_v12  ;;  %v59_v16 = vrot.slane %v50_v13, %v58_v14  ;;  %s244_s25 = scalar_lea.vmem %s180_s24, 256  ;;  %p249_p11 = scmp.lt.s32.totalorder %s180_s24, %s180_s24 }
  0x21   :  { %96 = vmatprep.subr.mxu0 %v43_v7  ;;  %p245_p10 = scmp.ne.s32.totalorder %s180_s24, %s244_s25  ;;  %p250_p12 = scmp.lt.s32.totalorder %s244_s25, %s244_s25 }
  0x22   :  { %97 = vmatpush1.msra.mxu0 %v42_v8 }
  0x23   :  { %189 = vmatmul.mubr.msk.f32.vlgmr.msra.gmra.mxu0 %vm62_vm0, %v41_v9  ;;  %p251_p13 = por %p250_p12, %p249_p11 }
  0x25   :  { %p252_p0 = pnand %p251_p13, %p245_p10 }
  0xe3   :  { %v132_v17 = vpop.f32.mrf.mxu0 }
  0xe4   :  { %v133_v18 = vadd.f32 %v132_v17, %v55_v15 }
  0xe5   :  { %v134_v19 = vpop.f32.mrf.mxu0 }
  0xe6   :  { %v137_v20 = vrot.slane %v133_v18, 4  ;;  %v135_v21 = vadd.f32 %v134_v19, %v59_v16 }
  0xe8   :  { %v138_v22 = vmax.f32 %v133_v18, %v137_v20  ;;  %v143_v23 = vrot.slane %v135_v21, 4 }
  0xea   :  { %v139_v24 = vrot.slane %v138_v22, 2  ;;  %v144_v25 = vmax.f32 %v135_v21, %v143_v23 }
  0xec   :  { %v140_v26 = vmax.f32 %v138_v22, %v139_v24  ;;  %v145_v27 = vrot.slane %v144_v25, 2 }
  0xee   :  { %v141_v28 = vrot.slane %v140_v26, 1  ;;  %v146_v29 = vmax.f32 %v144_v25, %v145_v27 }
  0xf0   :  { %v142_v30 = vmax.f32 %v140_v26, %v141_v28  ;;  %v147_v31 = vrot.slane %v146_v29, 1 }
  0xf2   :  { %v149_v32 = vsub.f32 %v133_v18, %v142_v30  ;;  %v148_v33 = vmax.f32 %v146_v29, %v147_v31 }
  0xf4   :  { %v151_v34 = vmul.f32 1.442695, %v149_v32  ;;  %v150_v35 = vsub.f32 %v135_v21, %v148_v33 }
  0xf6   :  { %196 = vpow2.f32 %v151_v34  ;;  %v153_v36 = vmul.f32 1.442695, %v150_v35 }
  0xf8   :  { %198 = vpow2.f32 %v153_v36 }
 0x103   :  { %v197_v37 = vpop.eup %196 }
 0x104   :  { %v155_v38 = vrot.slane %v197_v37, 4 }
 0x105   :  { %v199_v39 = vpop.eup %198 }
 0x106   :  { %v156_v40 = vadd.f32 %v197_v37, %v155_v38  ;;  %v161_v41 = vrot.slane %v199_v39, 4 }
 0x108   :  { %v157_v42 = vrot.slane %v156_v40, 2  ;;  %v162_v43 = vadd.f32 %v199_v39, %v161_v41 }
 0x10a   :  { %v158_v44 = vadd.f32 %v157_v42, %v156_v40  ;;  %v163_v45 = vrot.slane %v162_v43, 2 }
 0x10c   :  { %v159_v46 = vrot.slane %v158_v44, 1  ;;  %v164_v47 = vadd.f32 %v163_v45, %v162_v43 }
 0x10e   :  { %v160_v48 = vadd.f32 %v159_v46, %v158_v44  ;;  %v165_v49 = vrot.slane %v164_v47, 1 }
 0x110   :  { %v166_v50 = vadd.f32 %v165_v49, %v164_v47  ;;  %200 = vrcp.f32 %v160_v48 }
 0x112   :  { %202 = vrcp.f32 %v166_v50 }
 0x11d   :  { %v201_v51 = vpop.eup %200 }
 0x11e   :  { %v169_v52 = vmul.f32 %v201_v51, %v197_v37 }
 0x11f   :  { %v203_v53 = vpop.eup %202 }
 0x120   :  { %v170_v54 = vmul.f32 %v203_v53, %v199_v39  ;;  %171 = vst [vmem:[#allocation7] sm:$0xff] %v169_v52 }
 0x122   :  { %172 = vst [vmem:[#allocation7 + $0x8] sm:$0xff] %v170_v54 }
 0x123   :  { %255 = shalt.err (!%p252_p0)
}
 0x124   :  { %182 = dma.vmem_to_hbm [thread:$0]  %s180_s24, 256, %s311_s3, [#allocation4]  }
 0x125   :  { %268 = dma.done.wait [#allocation4], 256  }
 0x126   :  { %269 = vsyncadd [#allocation4], 4294967040 }
 0x127   :  { %186 = vsyncpa [#allocation3], 1 }
 0x128   :  { %187 = vsyncpa [#allocation6], 1 }
 0x129   :  { %188 = vsyncpa [#allocation4], 1 }

</bundles_post_ra>
